<compile_context>
chip_gen: v7x
topology: tpu7x:2x2x1
jax: 0.10.0
libtpu: 0.0.40
codegen_flags: <defaults>
</compile_context>

<pallas_src>
import functools

import jax
import jax.numpy as jnp
from jax.experimental import pallas as pl
from jax.experimental.pallas import tpu as pltpu


def _lin_softmax_kernel(x_ref, w_ref, b_ref, o_ref):
    # x_ref: (tm, d); w_ref: (d, k); b_ref: (1, k); o_ref: (tm, k).
    logits = jnp.dot(x_ref[...], w_ref[...],
                     preferred_element_type=jnp.float32)
    logits = logits + b_ref[...].astype(jnp.float32)
    # Numerically stable softmax over the belief dim, all in f32.
    m = jnp.max(logits, axis=-1, keepdims=True)
    e = jnp.exp(logits - m)
    denom = jnp.sum(e, axis=-1, keepdims=True)
    # Exact division (not pl.reciprocal(approx=True)): the approx path's
    # ~2^-12 relative error broke the output tolerances; the divide cost is
    # hidden behind HBM traffic.
    o_ref[...] = (e / denom).astype(o_ref.dtype)


def _round_up(n, m):
    return ((n + m - 1) // m) * m


def _vmem_capacity_bytes():
    try:
        return int(pltpu.get_tpu_info().vmem_capacity_bytes)
    except Exception:
        return 64 << 20  # conservative fallback: v7x per-TC VMEM


def _choose_tm(rows, d, k, itemsize, tm_cap, vmem_budget):
    """Largest row tile (multiple of 8, <= tm_cap) fitting the VMEM budget."""
    # Grid-invariant operands; counted double-buffered (conservative).
    wb_bytes = 2 * (d * k * itemsize + k * 4)
    per_row = (2 * d * itemsize      # x tile, double-buffered
               + 2 * k * itemsize    # out tile, double-buffered
               + 8 * k               # f32 logits + f32 exp intermediates
               + k * itemsize)       # output-cast temp
    avail = max(vmem_budget - wb_bytes, 8 * per_row)
    tm = min(tm_cap, max(rows, 8), avail // per_row)
    tm = max(8, (int(tm) // 8) * 8)
    # Keep >= 2 grid steps when there is enough work so the "parallel" grid
    # axis can shard across both v7x TensorCores.
    if rows >= 16:
        tm = min(tm, _round_up(-(-rows // 2), 8))
    return max(8, (tm // 8) * 8)


@functools.partial(jax.jit, static_argnames=("tm_cap",))
def lin_belief_decoder(x, w, b, *, tm_cap=4096):
    """x: (..., input_dim); w: (input_dim, belief_dim); b: (belief_dim,)."""
    orig_shape = x.shape
    d = orig_shape[-1]
    k = w.shape[1]
    dtype = x.dtype
    itemsize = jnp.dtype(dtype).itemsize

    x2 = x.reshape(-1, d)
    rows = x2.shape[0]

    w = w.astype(dtype)
    b2 = b.astype(jnp.float32).reshape(1, k)   # bias stays f32 (tiny)

    vmem_cap = _vmem_capacity_bytes()
    vmem_budget = vmem_cap * 11 // 16           # ~70% of physical VMEM
    tm = _choose_tm(rows, d, k, itemsize, tm_cap, vmem_budget)

    # Non-divisible rows: let Pallas mask the final partial block instead of
    # padding x in the wrapper (no extra HBM pass over the input).
    grid = (pl.cdiv(rows, tm),)

    # Explicit scoped-VMEM limit from the per-step footprint, generation-aware
    # clamp (<= 3/4 of physical: 48 MiB on v7x, 96 MiB on v5e/v6e).
    step_bytes = (2 * tm * d * itemsize          # x tile (double-buffered)
                  + 2 * tm * k * itemsize        # out tile (double-buffered)
                  + 2 * (d * k * itemsize + k * 4)  # weight + bias
                  + tm * k * (8 + itemsize))     # f32 logits/exp + cast temp
    vmem_limit = int(min(max(2 * step_bytes, 32 << 20), vmem_cap * 3 // 4))

    out = pl.pallas_call(
        _lin_softmax_kernel,
        out_shape=jax.ShapeDtypeStruct((rows, k), dtype),
        grid=grid,
        in_specs=[
            pl.BlockSpec((tm, d), lambda i: (i, 0)),
            # Grid-invariant operands (constant index_map): DMA'd once and
            # kept resident, not re-fetched each step.
            pl.BlockSpec((d, k), lambda i: (0, 0)),
            pl.BlockSpec((1, k), lambda i: (0, 0)),
        ],
        out_specs=pl.BlockSpec((tm, k), lambda i: (i, 0)),
        compiler_params=pltpu.CompilerParams(
            dimension_semantics=("parallel",),
            vmem_limit_bytes=vmem_limit,
        ),
    )(x2, w, b2)

    return out.reshape(*orig_shape[:-1], k)


if __name__ == "__main__":
    # Small shapes consistent with the module: batch=2, seq=8, input_dim=32,
    # belief_dim=16.
    batch, seq, input_dim, belief_dim = 2, 8, 32, 16

    key = jax.random.PRNGKey(0)
    kx, kw, kb, kx2 = jax.random.split(key, 4)

    x = jax.random.normal(kx, (batch, seq, input_dim), dtype=jnp.float32)
    # Deterministic param init (mimics nn.Linear's uniform(-1/sqrt(fan_in), .)).
    bound = 1.0 / jnp.sqrt(jnp.float32(input_dim))
    w = jax.random.uniform(kw, (input_dim, belief_dim), jnp.float32,
                           -bound, bound)
    b = jax.random.uniform(kb, (belief_dim,), jnp.float32, -bound, bound)

    out = lin_belief_decoder(x, w, b)
    out = jax.block_until_ready(out)

    ref = jax.nn.softmax(x @ w + b, axis=-1)
    assert out.shape == (batch, seq, belief_dim)
    # Tolerances allow for MXU f32 matmul-pass precision differences vs XLA.
    assert jnp.allclose(out, ref, atol=1e-4, rtol=1e-3)
    assert jnp.allclose(jnp.sum(out, axis=-1), 1.0, atol=1e-5)

    # Second check: row count not divisible by the tile -> exercises the
    # multi-step grid and the masked partial final block.
    x_odd = jax.random.normal(kx2, (3, 5, input_dim), dtype=jnp.float32)
    out_odd = jax.block_until_ready(lin_belief_decoder(x_odd, w, b))
    ref_odd = jax.nn.softmax(x_odd @ w + b, axis=-1)
    assert out_odd.shape == (3, 5, belief_dim)
    assert jnp.allclose(out_odd, ref_odd, atol=1e-4, rtol=1e-3)
    assert jnp.allclose(jnp.sum(out_odd, axis=-1), 1.0, atol=1e-5)

    print("KERNEL_OK")
</pallas_src>

<mosaic_0001>
module attributes {stable_mosaic.version = 11 : i64} {
  func.func @_lin_softmax_kernel(%arg0: i32, %arg1: memref<8x32xf32, #tpu.memory_space<vmem>>, %arg2: memref<32x16xf32, #tpu.memory_space<vmem>>, %arg3: memref<1x16xf32, #tpu.memory_space<vmem>>, %arg4: memref<8x16xf32, #tpu.memory_space<vmem>>) attributes {dimension_semantics = [#tpu.dimension_semantics<parallel>], iteration_bounds = array<i64: 2>, scalar_prefetch = 0 : i64, scratch_operands = 0 : i64, tpu.core_type = #tpu.core_type<tc>, window_params = [{transform_indices = @transform_0, window_bounds = array<i64: 8, 32>}, {pipeline_mode = #tpu.pipeline_mode<synchronous>, transform_indices = @transform_1, window_bounds = array<i64: 32, 16>}, {pipeline_mode = #tpu.pipeline_mode<synchronous>, transform_indices = @transform_2, window_bounds = array<i64: 1, 16>}, {transform_indices = @transform_3, window_bounds = array<i64: 8, 16>}]} {
    %c0 = arith.constant 0 : index
    %c0_0 = arith.constant 0 : index
    %0 = vector.load %arg1[%c0, %c0_0] : memref<8x32xf32, #tpu.memory_space<vmem>>, vector<8x32xf32>
    %c0_1 = arith.constant 0 : index
    %c0_2 = arith.constant 0 : index
    %1 = vector.load %arg2[%c0_1, %c0_2] : memref<32x16xf32, #tpu.memory_space<vmem>>, vector<32x16xf32>
    %cst = arith.constant dense<0.000000e+00> : vector<8x16xf32>
    %2 = tpu.matmul %0, %1, %cst {dimension_numbers = #tpu.dot_dimension_numbers<[1], [0], [0], [1], [0, 0, 1, 1], [], []>} : vector<8x32xf32>, vector<32x16xf32>, vector<8x16xf32> -> vector<8x16xf32>
    %c0_3 = arith.constant 0 : index
    %c0_4 = arith.constant 0 : index
    %3 = vector.load %arg3[%c0_3, %c0_4] : memref<1x16xf32, #tpu.memory_space<vmem>>, vector<1x16xf32>
    %4 = vector.broadcast %3 : vector<1x16xf32> to vector<8x16xf32>
    %5 = arith.addf %2, %4 : vector<8x16xf32>
    %cst_5 = arith.constant dense<0xFF800000> : vector<8xf32>
    %6 = vector.multi_reduction <maximumf>, %5, %cst_5 [1] : vector<8x16xf32> to vector<8xf32>
    %7 = vector.shape_cast %6 : vector<8xf32> to vector<8x1xf32>
    %8 = vector.broadcast %7 : vector<8x1xf32> to vector<8x16xf32>
    %9 = arith.subf %5, %8 : vector<8x16xf32>
    %10 = math.exp %9 : vector<8x16xf32>
    %cst_6 = arith.constant dense<0.000000e+00> : vector<8xf32>
    %11 = vector.multi_reduction <add>, %10, %cst_6 [1] : vector<8x16xf32> to vector<8xf32>
    %12 = vector.shape_cast %11 : vector<8xf32> to vector<8x1xf32>
    %13 = vector.broadcast %12 : vector<8x1xf32> to vector<8x16xf32>
    %14 = arith.divf %10, %13 : vector<8x16xf32>
    %c0_7 = arith.constant 0 : index
    %c0_8 = arith.constant 0 : index
    %15 = vector.load %arg4[%c0_7, %c0_8] : memref<8x16xf32, #tpu.memory_space<vmem>>, vector<8x16xf32>
    tpu.vector_store %arg4[%c0_7, %c0_8], %14 {strides = array<i32>} : memref<8x16xf32, #tpu.memory_space<vmem>>, vector<8x16xf32>,
    return
  }
  func.func @transform_0(%arg0: i32) -> (i32, i32) {
    %c0_i32 = arith.constant 0 : i32
    %c0_i32_0 = arith.constant 0 : i32
    return %arg0, %c0_i32 : i32, i32
  }
  func.func @transform_1(%arg0: i32) -> (i32, i32) {
    %c0_i32 = arith.constant 0 : i32
    %c0_i32_0 = arith.constant 0 : i32
    %c0_i32_1 = arith.constant 0 : i32
    return %c0_i32, %c0_i32_0 : i32, i32
  }
  func.func @transform_2(%arg0: i32) -> (i32, i32) {
    %c0_i32 = arith.constant 0 : i32
    %c0_i32_0 = arith.constant 0 : i32
    %c0_i32_1 = arith.constant 0 : i32
    return %c0_i32, %c0_i32_0 : i32, i32
  }
  func.func @transform_3(%arg0: i32) -> (i32, i32) {
    %c0_i32 = arith.constant 0 : i32
    %c0_i32_0 = arith.constant 0 : i32
    return %arg0, %c0_i32 : i32, i32
  }
}

</mosaic_0001>

<bundles_post_ra>
// kernel: lin_belief_decoder.1
= control target key start
LH: loop header
LB: loop body
LE: loop exit
PB: predicated region body
PF: predicated region fallthrough
CT: control target
= control target key end

     0   :  { %8 = vsyncpa [#allocation3], 0  ;;  %s624_s0 = inlined_call_operand.vmem [shape: f32[16,32], index: 0, kind: input, shape index: {}]   ;;  %s625_s1 = inlined_call_operand.vmem [shape: f32[32,16], index: 1, kind: input, shape index: {}]   ;;  %s626_s2 = inlined_call_operand.vmem [shape: f32[1,16], index: 2, kind: input, shape index: {}]   ;;  %s627_s3 = inlined_call_operand.hbm [shape: f32[16,16], index: 3, kind: output, shape index: {}]  }
   0x1   :  { %10 = vsyncpa [#allocation3 + $0x1], 0  ;;  %s506_s12 = smov 0   ;;  %s508_s13 = smov 0  }
   0x2   :  { %s510_s14 = smov 0   ;;  %s512_s15 = smov 0  }
   0x3 LB: > { %s527_s16 = sadd.s32 4294967295, %s480_s15   ;;  %s338_s17 = sadd.s32 4294967294, %s480_s15   ;;  %s480_s15 = sphi %s512_s15, %s633_s15   ;;  %s476_s14 = sphi %s510_s14, %s632_s14   ;;  %s472_s13 = sphi %s508_s13, %s631_s13   ;;  %s468_s12 = sphi %s506_s12, %s630_s12  }
   0x4   : > { %s531_s18 = sadd.s32 1, %s480_s15   ;;  %s91_s19 = sadd.s32 1, %s476_s14 }
   0x5   : > { %s88_s20 = ssub.s32 %s480_s15, %s531_s18  ;;  %p101_p0 = scmp.ne.s32.totalorder %s476_s14, %s472_s13 }
   0x6   : > { %p89_p1 = scmp.eq.s32.totalorder %s88_s20, 0  ;;  %p102_p2 = scmp.eq.s32.totalorder %s527_s16, 1 }
   0x7   : > { %p107_p3 = scmp.ne.s32.totalorder %s472_s13, %s468_s12  ;;  %p108_p4 = scmp.eq.s32.totalorder %s338_s17, 1 }
   0x8   : > { %s542_s21 = scalar_select %p89_p1, %s476_s14, %s91_s19  }
   0x9   : > { %p544_p5 = por %p102_p2, %p101_p0  ;;  %p548_p6 = por %p108_p4, %p107_p3 }
   0xa   : > { %p341_p7 = scmp.ge.s32.totalorder %s480_s15, 1  ;;  %p139_p8 = scmp.lt.s32.totalorder %s480_s15, 3 }
   0xc   : > { %p140_p9 = pnand %p341_p7, %p139_p8 }
   0xd   : > { %v167_v0 = vld [vmem:[%s625_s1] sm:$0xff] (!%p140_p9)  ;;  %v168_v1 = vld [vmem:[%s625_s1 + $0x8] sm:$0xff] (!%p140_p9)  ;;  %v169_v2 = vld [vmem:[%s625_s1 + $0x10] sm:$0xff] (!%p140_p9)  ;;  %v482_v3 = vmov (!%p140_p9), 0.0|0.0   ;;  %vm483_vm0 = vmmov (!%p140_p9), 0   ;;  %v484_v6 = vmov (!%p140_p9), 0.0  }
   0xe   : > { %143 = sbr.rel (%p140_p9) target bundleno = 568 (0x238), region = 32  ;;  %366 = vmatprep.subr.bf16.mxu0 (!%p140_p9), %v482_v3  ;;  %v367_v4 = vpack.c.bf16 (!%p140_p9), %v168_v1, %v167_v0  ;;  %v170_v5 = vld [vmem:[%s625_s1 + $0x18] sm:$0xff] (!%p140_p9)  ;;  %363 = vmatprep.mubr.msk.f32.mxu0 (!%p140_p9), %vm483_vm0, %v484_v6  ;;  %p162_p10 = scmp.lt.s32.totalorder (!%p140_p9), %s527_s16, 1  ;;  %vm178_vm1 = vcmask (!%p140_p9), 261120   ;;  %v344_v9 = vld [vmem:[%s626_s2] ss:$0 sm:$0xff] (!%p140_p9) }
   0xf   : > { %v370_v7 = vpack.c.bf16 (!%p140_p9), %v170_v5, %v169_v2  ;;  %vm252_vm2 = vcmask (!%p140_p9), 130048   ;;  %s159_s17 = sand.u32 (!%p140_p9), 1, %s472_s13   ;;  %s347_s20 = sshll.u32 (!%p140_p9), %s527_s16, 7 }
  0x10   : > { %368 = vmatpush3.bf16.msra.mxu0 (!%p140_p9), %v367_v4  ;;  %s342_s19 = sshll.u32 (!%p140_p9), %s159_s17, 3  ;;  %s581_s28 = scalar_lea.hbm (!%p140_p9), %s627_s3, %s347_s20 }
  0x11   : > { %369 = vmatprep.subr.bf16.mxu0 (!%p140_p9), %v482_v3  ;;  %s161_s24 = scalar_lea.vmem (!%p140_p9), [#allocation2], %s342_s19  ;;  %s266_s29 = scalar_lea.sflag (!%p140_p9), [#allocation3], %s159_s17 }
  0x12   : > { %s279_s25 = sshll.u32 (!%p140_p9), %s161_s24, 4  ;;  %s583_s25 = int_to_ptr.vmem [resolvable:$true] %s279_s25 }
  0x13   : > { %s418_s30 = scalar_lea.vmem (!%p140_p9), %s583_s25, 128 }
  0x14   : > { %371 = vmatpush3.bf16.msra.mxu0 (!%p140_p9), %v370_v7  ;;  %p419_p11 = scmp.ne.s32.totalorder (!%p140_p9), %s583_s25, %s418_s30 }
  0x15   : > { %s163_s5 = scalar_select %p162_p10, %s527_s16, 1 }
  0x16   : > { %p420_p12 = pnand %p419_p11, %p544_p5  ;;  %s485_s16 = smov [#allocation2]  }
  0x17   : > { %s343_s6 = sshll.u32 %s163_s5, 3  ;;  %s422_s4 = sshll.u32 %s485_s16, 4  ;;  %s423_s4 = int_to_ptr.vmem [resolvable:$false] %s422_s4 }
  0x18   : > { %s165_s9 = scalar_lea.vmem %s624_s0, %s343_s6  ;;  %p421_p13 = pneg %p420_p12 }
  0x19   : > { %v166_v8 = vld [vmem:[%s165_s9] sm:$0xff]  ;;  %s424_s5 = scalar_lea.vmem %s423_s4, 256  ;;  %p425_p0 = scmp.lt.s32.totalorder %s583_s25, %s423_s4 }
  0x1a   : > { %364 = vmatmul.mubr.msk.f32.vlgmr.msra.gmra.mrb[0].mxu0 %vm178_vm1, %v166_v8  ;;  %p426_p1 = scmp.lt.s32.totalorder %s424_s5, %s418_s30 }
  0x1c   : > { %p427_p2 = por %p426_p1, %p425_p0 }
  0x1e   : > { %p428_p3 = pnand %p427_p2, %p421_p13 }
  0xed   : > { %v248_v10 = vpop.f32.mrb[0].mxu0 }
  0xee   : > { %v249_v11 = vadd.f32 %v344_v9, %v248_v10  ;;  %v365_v12 = vpop.f32.mrb[1].mxu0 }
  0xf0   : > { %v253_v13 = vsel %vm252_vm2, %v249_v11, -inf }
  0xf1   : > { %254 = vmax.xlane.f32.xlu0 %v253_v13 }
 0x17e   : > { %v255_v14 = vpop.xlane.xlu0 %254 }
 0x17f   : > { %v256_v15 = vsub.f32 %v249_v11, %v255_v14 }
 0x181   : > { %v257_v16 = vmul.f32 1.442695, %v256_v15 }
 0x183   : > { %414 = vpow2.f32 %v257_v16 }
 0x18d   : > { %v415_v17 = vpop.eup %414 }
 0x18e   : > { %v259_v18 = vsel %vm252_vm2, %v415_v17, 0.0 }
 0x18f   : > { %260 = vadd.xlane.f32.xlu0 %v259_v18 }
 0x21c   : > { %v261_v19 = vpop.xlane.xlu0 %260 }
 0x21d   : > { %416 = vrcp.f32 %v261_v19 }
 0x227   : > { %v417_v20 = vpop.eup %416 }
 0x228   : > { %v263_v21 = vmul.f32 %v417_v20, %v415_v17 }
 0x22a   : > { %264 = vst.msk [vmem:[%s161_s24] sm:$0xff] %vm252_vm2, %v263_v21 }
 0x22b   : > { %431 = shalt.err (!%p428_p3)
}
 0x22c   : > { %s432_s6 = scalar_lea.hbm %s581_s28, 128  ;;  %s436_s9 = scalar_lea.hbm %s627_s3, 256 }
 0x22d   : > { %p433_p4 = scmp.ne.s32.totalorder %s581_s28, %s432_s6  ;;  %p437_p9 = scmp.lt.u32.totalorder %s581_s28, %s627_s3 }
 0x22e   : > { %p438_p10 = scmp.lt.u32.totalorder %s436_s9, %s432_s6  ;;  %p440_p12 = scmp.lt.u32.totalorder %s432_s6, %s581_s28 }
 0x22f   : > { %p434_p7 = pnand %p433_p4, %p544_p5 }
 0x230   : > { %p439_p11 = por %p438_p10, %p437_p9 }
 0x231   : > { %p435_p8 = pneg %p434_p7 }
 0x232   : > { %p441_p13 = por %p440_p12, %p439_p11 }
 0x234   : > { %p442_p0 = pnand %p441_p13, %p435_p8 }
 0x236   : > { %445 = shalt.err (!%p442_p0)
}
 0x237   : > { %372 = dma.vmem_to_hbm [thread:$0]  (%p544_p5), %s583_s25, 128, %s581_s28, %s266_s29  }
 0x238 PF: > { %p378_p1 = scmp.ge.s32.totalorder %s480_s15, 2  ;;  %s291_s17 = sand.u32 1, %s468_s12  }
 0x239   : > { %s292_s19 = scalar_lea.sflag [#allocation3], %s291_s17 }
 0x23a   : > { %p375_p2 = pnand %p378_p1, %p548_p6 }
 0x23c   : > { %463 = dma.done.wait (!%p375_p2), %s292_s19, 128  }
 0x23d   : > { %465 = vsyncadd (!%p375_p2), %s292_s19, 4294967168  ;;  %p13_p3 = scmp.ge.s32.totalorder %s531_s18, 4   ;;  %s630_s12 = smov %s472_s13 }
 0x23e   : > { %s631_s13 = smov %s476_s14  ;;  %s632_s14 = smov %s542_s21 }
 0x23f   : > { %s633_s15 = smov %s531_s18  ;;  %15 = sbr.rel (!%p13_p3) target bundleno = 3 (0x3), region = 67 }
 0x246   :  { %297 = vsyncpa [#allocation3], 1 }
 0x247   :  { %299 = vsyncpa [#allocation3 + $0x1], 1 }

</bundles_post_ra>
